<compile_context>
chip_gen: v5e
topology: v5e:2x2
jax: 0.10.0
libtpu: 0.0.40
codegen_flags: <defaults>
</compile_context>

<pallas_src>
import functools

import numpy as np
import jax
import jax.numpy as jnp
from jax.experimental import pallas as pl
from jax.experimental.pallas import tpu as pltpu


def _pixel_perm_kernel(idx_ref, x_ref, o_ref, *, tk, n_chunks):
    """One output-pixel tile of out[C, M] = x[C, N] gathered by shuffle_idx.

    idx_ref: [1, TM] int32   -- source pixel index for each output pixel in this tile
    x_ref:   [C, N_pad]      -- whole flattened image, VMEM-resident across the grid
    o_ref:   [C, TM]         -- output pixel tile m
    """
    C = x_ref.shape[0]
    tm = idx_ref.shape[1]

    idx = idx_ref[...]                                          # hoisted out of k loop
    src = jax.lax.broadcasted_iota(jnp.int32, (tk, tm), 0)      # constant across chunks

    def body(kk, acc):
        k0 = pl.multiple_of(kk * tk, tk)
        # Shift the [1, TM] index row instead of the [TK, TM] iota (cheap VPU op).
        onehot = (src == (idx - kk * tk)).astype(x_ref.dtype)   # exact 0/1
        return acc + jnp.dot(
            x_ref[:, pl.ds(k0, tk)],
            onehot,
            precision=jax.lax.Precision.HIGHEST,                # bit-exact f32 copy
            preferred_element_type=jnp.float32,
        )

    acc = jax.lax.fori_loop(0, n_chunks, body, jnp.zeros((C, tm), jnp.float32))
    o_ref[...] = acc.astype(o_ref.dtype)


def _round_up(n, m):
    return (n + m - 1) // m * m


def random_pixel_perm_pallas(x, shuffle_idx):
    """x: [C, W, H]; shuffle_idx: int32[W*H] permutation (shared by all channels).

    Returns [C, W, H] with out[c].flatten()[i] = x[c].flatten()[shuffle_idx[i]],
    exactly the RandomPixelPerm forward pass with randperm made explicit.
    NOTE: correctness relies on shuffle_idx being a permutation (no duplicates);
    duplicates would double-count in the one-hot matmul formulation.
    """
    C, W, H = x.shape
    N = W * H

    # ---- tile sizing -------------------------------------------------------
    # Output-pixel tile (lane axis, dense multiple of 128).  Keep gm >= 2 when the
    # image allows it so the "parallel" grid axis can shard across two TensorCores.
    tm = min(512, _round_up(N, 128))
    if _round_up(N, tm) // tm < 2 and _round_up(N, 128) >= 256:
        tm = max(128, (tm // 2) // 128 * 128)
    N_pad = _round_up(N, tm)
    tk = 128 if N_pad > 128 else N_pad        # small source chunks: no big spills
    n_chunks = N_pad // tk
    gm = N_pad // tm

    # ---- pad to aligned sizes (no-op when already aligned) ------------------
    x2 = x.reshape(C, N)                                   # contiguous -> free
    idx2 = shuffle_idx.astype(jnp.int32).reshape(1, N)
    if N_pad != N:
        x2 = jnp.pad(x2, ((0, 0), (0, N_pad - N)))
        idx2 = jnp.pad(idx2, ((0, 0), (0, N_pad - N)))     # padded outputs gather pixel 0

    itemsize = jnp.dtype(x.dtype).itemsize
    cost = pl.CostEstimate(
        flops=2 * C * N_pad * N_pad,                       # one-hot matmul performed
        transcendentals=0,
        bytes_accessed=2 * C * N_pad * itemsize + N_pad * 4,  # x once + out once + idx
    )

    vmem_needed = (C * N_pad * itemsize                    # resident x
                   + 2 * C * tm * itemsize                 # double-buffered out blocks
                   + 2 * tm * 4                            # double-buffered idx blocks
                   + tk * tm * 8                           # iota + one-hot intermediates
                   + C * tm * 4)                           # accumulator carry
    vmem_limit = int(min(max(2 * vmem_needed, 8 << 20), 64 << 20))

    kernel = functools.partial(_pixel_perm_kernel, tk=tk, n_chunks=n_chunks)

    out2 = pl.pallas_call(
        kernel,
        out_shape=jax.ShapeDtypeStruct((C, N_pad), x.dtype),
        grid=(gm,),
        in_specs=[
            pl.BlockSpec((1, tm), lambda m: (0, m)),       # shuffle_idx tile for block m
            pl.BlockSpec((C, N_pad), lambda m: (0, 0)),    # whole image, fetched once
        ],
        out_specs=pl.BlockSpec((C, tm), lambda m: (0, m)),
        compiler_params=pltpu.CompilerParams(
            dimension_semantics=("parallel",),
            vmem_limit_bytes=vmem_limit,
        ),
        cost_estimate=cost,
    )(idx2, x2)

    if N_pad != N:
        out2 = out2[:, :N]
    return out2.reshape(C, W, H)


def _random_pixel_perm_reference(x, shuffle_idx):
    """Pure-JAX reference of the module semantics, for validation."""
    C, W, H = x.shape
    return x.reshape(C, -1)[:, shuffle_idx].reshape(C, W, H)


if __name__ == "__main__":
    # Small shapes consistent with the module: x is [c, w, h] with 3 channels.
    C, W, H = 3, 16, 16
    key = jax.random.PRNGKey(0)
    kx, kp = jax.random.split(key)

    x = jax.random.normal(kx, (C, W, H), dtype=jnp.float32)
    # Deterministic stand-in for torch.randperm(w*h), same perm for every channel.
    shuffle_idx = jax.random.permutation(kp, W * H).astype(jnp.int32)

    out = jax.block_until_ready(random_pixel_perm_pallas(x, shuffle_idx))

    ref = _random_pixel_perm_reference(x, shuffle_idx)
    np.testing.assert_allclose(np.asarray(out), np.asarray(ref),
                               rtol=1e-6, atol=1e-6)
    assert out.shape == (C, W, H)
    print("KERNEL_OK")
</pallas_src>

<mosaic_0001>
module attributes {stable_mosaic.version = 11 : i64} {
  func.func @_pixel_perm_kernel(%arg0: i32, %arg1: memref<1x128xi32, #tpu.memory_space<vmem>>, %arg2: memref<3x256xf32, #tpu.memory_space<vmem>>, %arg3: memref<3x128xf32, #tpu.memory_space<vmem>>) attributes {dimension_semantics = [#tpu.dimension_semantics<parallel>], iteration_bounds = array<i64: 2>, scalar_prefetch = 0 : i64, scratch_operands = 0 : i64, tpu.core_type = #tpu.core_type<tc>, window_params = [{transform_indices = @transform_0, window_bounds = array<i64: 1, 128>}, {pipeline_mode = #tpu.pipeline_mode<synchronous>, transform_indices = @transform_1, window_bounds = array<i64: 3, 256>}, {transform_indices = @transform_2, window_bounds = array<i64: 3, 128>}]} {
    %c0 = arith.constant 0 : index
    %c0_0 = arith.constant 0 : index
    %0 = vector.load %arg1[%c0, %c0_0] : memref<1x128xi32, #tpu.memory_space<vmem>>, vector<1x128xi32>
    %1 = tpu.iota {dimensions = array<i32: 0>} : vector<128x128xi32>
    %cst = arith.constant 0.000000e+00 : f32
    %2 = vector.broadcast %cst : f32 to vector<3x128xf32>
    %c0_i32 = arith.constant 0 : i32
    %c2_i32 = arith.constant 2 : i32
    %3 = arith.addi %c0_i32, %c2_i32 : i32
    %c1_i32 = arith.constant 1 : i32
    %4 = scf.for %arg4 = %c0_i32 to %3 step %c1_i32 iter_args(%arg5 = %2) -> (vector<3x128xf32>)  : i32 {
      %c128_i32 = arith.constant 128 : i32
      %6 = arith.muli %arg4, %c128_i32 : i32
      %7 = tpu.assume_multiple %6, 128 : i32
      %c128_i32_4 = arith.constant 128 : i32
      %8 = arith.muli %arg4, %c128_i32_4 : i32
      %9 = vector.broadcast %8 : i32 to vector<1x128xi32>
      %10 = arith.subi %0, %9 : vector<1x128xi32>
      %11 = vector.broadcast %10 : vector<1x128xi32> to vector<128x128xi32>
      %12 = arith.cmpi eq, %1, %11 : vector<128x128xi32>
      %13 = arith.extui %12 : vector<128x128xi1> to vector<128x128xi32>
      %14 = arith.sitofp %13 : vector<128x128xi32> to vector<128x128xf32>
      %c0_5 = arith.constant 0 : index
      %15 = arith.index_cast %7 : i32 to index
      %16 = vector.load %arg2[%c0_5, %15] : memref<3x256xf32, #tpu.memory_space<vmem>>, vector<3x128xf32>
      %cst_6 = arith.constant dense<0.000000e+00> : vector<3x128xf32>
      %17 = tpu.matmul %16, %14, %cst_6 {dimension_numbers = #tpu.dot_dimension_numbers<[1], [0], [0], [1], [0, 0, 1, 1], [], []>, precision = #tpu.contract_precision<fp32>} : vector<3x128xf32>, vector<128x128xf32>, vector<3x128xf32> -> vector<3x128xf32>
      %18 = arith.addf %arg5, %17 : vector<3x128xf32>
      scf.yield %18 : vector<3x128xf32>
    }
    %c2_i32_1 = arith.constant 2 : i32
    %c0_2 = arith.constant 0 : index
    %c0_3 = arith.constant 0 : index
    %5 = vector.load %arg3[%c0_2, %c0_3] : memref<3x128xf32, #tpu.memory_space<vmem>>, vector<3x128xf32>
    tpu.vector_store %arg3[%c0_2, %c0_3], %4 {strides = array<i32>} : memref<3x128xf32, #tpu.memory_space<vmem>>, vector<3x128xf32>,
    return
  }
  func.func @transform_0(%arg0: i32) -> (i32, i32) {
    %c0_i32 = arith.constant 0 : i32
    %c0_i32_0 = arith.constant 0 : i32
    return %c0_i32, %arg0 : i32, i32
  }
  func.func @transform_1(%arg0: i32) -> (i32, i32) {
    %c0_i32 = arith.constant 0 : i32
    %c0_i32_0 = arith.constant 0 : i32
    %c0_i32_1 = arith.constant 0 : i32
    return %c0_i32, %c0_i32_0 : i32, i32
  }
  func.func @transform_2(%arg0: i32) -> (i32, i32) {
    %c0_i32 = arith.constant 0 : i32
    %c0_i32_0 = arith.constant 0 : i32
    return %c0_i32, %arg0 : i32, i32
  }
}

</mosaic_0001>

<bundles_post_ra>
// kernel: tpu_custom_call.1
= control target key start
LH: loop header
LB: loop body
LE: loop exit
PB: predicated region body
PF: predicated region fallthrough
CT: control target
= control target key end

     0   :  { %7 = vsyncpa [#allocation3], 0  ;;  %s1668_s0 = inlined_call_operand.hbm [shape: s32[1,256], index: 0, kind: input, shape index: {}]   ;;  %s1669_s1 = inlined_call_operand.hbm [shape: f32[3,256], index: 1, kind: input, shape index: {}]   ;;  %s1670_s2 = inlined_call_operand.hbm [shape: f32[3,256], index: 2, kind: output, shape index: {}]  }
   0x1   :  { %9 = vsyncpa [#allocation3 + $0x1], 0 }
   0x2   :  { %10 = vsyncpa [#allocation6], 0 }
   0x3   :  { %11 = vsyncpa [#allocation4], 0 }
   0x4   :  { %13 = vsyncpa [#allocation4 + $0x1], 0  ;;  %s1017_s9 = smov 0   ;;  %s1019_s10 = smov 0  }
   0x5   :  { %s1021_s11 = smov 0   ;;  %s1023_s12 = smov 0  }
   0x6 LB: > { %s1038_s13 = sadd.s32 4294967295, %s989_s12   ;;  %s699_s14 = sadd.s32 4294967294, %s989_s12   ;;  %s989_s12 = sphi %s1023_s12, %s1681_s12   ;;  %s985_s11 = sphi %s1021_s11, %s1680_s11   ;;  %s981_s10 = sphi %s1019_s10, %s1679_s10   ;;  %s977_s9 = sphi %s1017_s9, %s1678_s9  }
   0x7   : > { %p39_p0 = scmp.ne.s32.totalorder %s981_s10, %s977_s9  ;;  %p40_p1 = scmp.eq.s32.totalorder %s1038_s13, 0 }
   0x8   : > { %p84_p2 = scmp.eq.s32.totalorder %s1038_s13, 1  ;;  %p90_p3 = scmp.eq.s32.totalorder %s699_s14, 1 }
   0x9   : > { %p1047_p4 = por %p40_p1, %p39_p0  ;;  %p700_p5 = scmp.ge.s32.totalorder %s989_s12, 1 }
   0xa   : > { %p1052_p6 = por %p90_p3, %p39_p0  ;;  %p97_p7 = scmp.lt.s32.totalorder %s989_s12, 3 }
   0xb   : > { %s109_s19 = sshll.u32 %s1669_s1, 4  ;;  %s999_s21 = smov [#allocation5]   ;;  %s110_s19 = int_to_ptr.hbm [resolvable:$true] %s109_s19 }
   0xc   : > { %p1060_p8 = pnand %p700_p5, %p97_p7  ;;  %s111_s22 = sshll.u32 %s999_s21, 4  ;;  %s112_s22 = int_to_ptr.vmem [resolvable:$true] %s111_s22 }
   0xd   : > { %s1070_s23 = sadd.s32 1, %s989_s12   ;;  %s26_s24 = sadd.s32 1, %s985_s11 }
   0xe   : > { %p784_p10 = pneg %p1060_p8  ;;  %s23_s25 = ssub.s32 %s989_s12, %s1070_s23 }
   0xf   : > { %p24_p12 = scmp.eq.s32.totalorder %s23_s25, 0  ;;  %p33_p13 = scmp.ne.s32.totalorder %s985_s11, %s981_s10 }
  0x10   : > { %p785_p11 = pnand %p784_p10, %p40_p1  ;;  %p34_p0 = scmp.eq.s32.totalorder %s989_s12, 0 }
  0x11   : > { %p797_p3 = scmp.lt.s32.totalorder %s989_s12, 2  ;;  %p1084_p7 = por %p84_p2, %p33_p13 }
  0x12   : > { %787 = dma.hbm_to_vmem [thread:$0]  (!%p785_p11), %s110_s19, 128, %s112_s22, [#allocation6]  }
  0x13   : > { %s1080_s26 = scalar_select %p24_p12, %s985_s11, %s26_s24  }
  0x14   : > { %p35_p5 = por %p34_p0, %p33_p13  ;;  %s122_s28 = sand.u32 1, %s985_s11  }
  0x15   : > { %s128_s3 = scalar_lea.hbm %s1668_s0, %s989_s12  ;;  %s125_s5 = scalar_lea.vmem [#allocation2], %s122_s28 }
  0x16   : > { %s130_s4 = sshll.u32 %s128_s3, 4  ;;  %s132_s6 = sshll.u32 %s125_s5, 4  ;;  %s131_s4 = int_to_ptr.hbm [resolvable:$true] %s130_s4  ;;  %s133_s6 = int_to_ptr.vmem [resolvable:$true] %s132_s6 }
  0x17   : > { %p1093_p10 = pnand %p797_p3, %p35_p5  ;;  %s123_s8 = scalar_lea.sflag [#allocation3], %s122_s28 }
  0x18   : > { %s881_s14 = sshra.s32 %s131_s4, 4  ;;  %s888_s21 = scalar_lea.hbm %s1668_s0, 2  ;;  %s882_s14 = int_to_ptr.hbm [resolvable:$true] %s881_s14 }
  0x19   : > { %s883_s17 = scalar_lea.hbm %s882_s14, 1  ;;  %p885_p11 = pneg %p1093_p10 }
  0x1a   : > { %p884_p2 = scmp.ne.s32.totalorder %s882_s14, %s883_s17  ;;  %p889_p0 = scmp.lt.s32.totalorder %s882_s14, %s1668_s0 }
  0x1b   : > { %p890_p3 = scmp.lt.s32.totalorder %s888_s21, %s883_s17 }
  0x1c   : > { %p886_p12 = pnand %p885_p11, %p884_p2 }
  0x1d   : > { %p891_p5 = por %p890_p3, %p889_p0 }
  0x1e   : > { %p887_p13 = pneg %p886_p12 }
  0x20   : > { %p892_p9 = pnand %p891_p5, %p887_p13 }
  0x22   : > { %895 = shalt.err (!%p892_p9)
}
  0x23   : > { %791 = dma.hbm_to_vmem [thread:$0]  (!%p1093_p10), %s131_s4, 16, %s133_s6, %s123_s8  }
  0x24   : > { %141 = sbr.rel (%p1060_p8) target bundleno = 264 (0x108), region = 28  ;;  %s1110_s25 = sand.u32 (!%p1060_p8), 1, %s981_s10  }
  0x25   : > { %s144_s28 = scalar_lea.sflag (!%p1060_p8), [#allocation3], %s1110_s25  ;;  %s146_s29 = scalar_lea.vmem (!%p1060_p8), [#allocation2], %s1110_s25 }
  0x29   : > { %964 = dma.done.wait (%p1047_p4), %s144_s28, 16  }
  0x2a   : > { %966 = vsyncadd (%p1047_p4), %s144_s28, 4294967280 }
  0x2b   : > { %968 = dma.done.wait (%p40_p1), [#allocation6], 128  }
  0x2c   : > { %970 = vsyncadd (%p40_p1), [#allocation6], 4294967168  ;;  %s705_s20 = sshll.u32 %s1110_s25, 2  ;;  %v173_v0 = vlaneseq  ;;  %v1161_v14 = vld [vmem:[%s146_s29] sm:$0x1]  ;;  %v1174_v18 = vmov 0.0  }
  0x2d   : > { %s1172_s15 = scalar_lea.vmem [#allocation7], %s705_s20  ;;  %s1176_s30 = smov 0  }
  0x2e   : > { %v1123_v1 = vshrl.u32 %v173_v0, 7 }
  0x30   : > { %v1126_v2 = vadd.s32 8, %v1123_v1  ;;  %v1129_v3 = vadd.s32 16, %v1123_v1  ;;  %v1132_v4 = vadd.s32 24, %v1123_v1  ;;  %v1135_v5 = vadd.s32 32, %v1123_v1 }
  0x31   : > { %v1138_v6 = vadd.s32 40, %v1123_v1  ;;  %v1141_v7 = vadd.s32 48, %v1123_v1  ;;  %v1144_v8 = vadd.s32 56, %v1123_v1  ;;  %v1147_v9 = vadd.s32 64, %v1123_v1 }
  0x32   : > { %v1150_v10 = vadd.s32 72, %v1123_v1  ;;  %v1153_v11 = vadd.s32 80, %v1123_v1  ;;  %v1156_v12 = vadd.s32 88, %v1123_v1  ;;  %v1159_v13 = vadd.s32 96, %v1123_v1 }
  0x33   : > { %v1164_v15 = vadd.s32 104, %v1123_v1  ;;  %v1167_v16 = vadd.s32 112, %v1123_v1  ;;  %v1170_v17 = vadd.s32 120, %v1123_v1 }
  0x34 LB: >> { %s706_s3 = sshll.u32 %s997_s30, 7  ;;  %v1000_v22 = vmov 1.0   ;;  %v1001_v23 = vmov 0.0   ;;  %s195_s30 = sadd.s32 1, %s997_s30   ;;  %s997_s30 = sphi %s1176_s30, %s195_s30   ;;  %v993_v18 = vphi %v1174_v18, %v1676_v18  }
  0x35   : >> { %v198_v19 = vstv %s706_s3  ;;  %s1304_s4 = sshra.s32 %s706_s3, 7  ;;  %p192_p1 = scmp.ge.s32.totalorder %s195_s30, 2  }
  0x36   : >> { %v199_v20 = vsub.s32 %v1161_v14, %v198_v19  ;;  %s723_s5 = sshll.u32 %s1304_s4, 2  ;;  %s773_s7 = sshll.u32 (%p192_p1), %s1038_s13, 2 }
  0x37   : >> { %s252_s6 = scalar_lea.vmem [#allocation5], %s723_s5  ;;  %s608_s17 = scalar_lea.hbm (%p192_p1), %s1670_s2, %s773_s7 }
  0x38   : >> { %v1188_v21 = vperm.slane %v199_v20, 0  ;;  %s610_s18 = sshll.u32 (%p192_p1), %s1172_s15, 4  ;;  %s612_s19 = sshll.u32 (%p192_p1), %s608_s17, 4  ;;  %s611_s18 = int_to_ptr.vmem [resolvable:$true] %s610_s18  ;;  %s613_s19 = int_to_ptr.hbm [resolvable:$true] %s612_s19 }
  0x39   : > { %s598_s21 = scalar_lea.sflag (%p192_p1), [#allocation4], %s1110_s25  ;;  %s925_s22 = sshra.s32 (%p192_p1), %s613_s19, 4  ;;  %s926_s22 = int_to_ptr.hbm [resolvable:$true] %s925_s22 }
  0x3a   : >> { %vm216_vm0 = vcmp.eq.s32.totalorder %v1170_v17, %v1188_v21  ;;  %vm215_vm1 = vcmp.eq.s32.totalorder %v1167_v16, %v1188_v21  ;;  %vm214_vm2 = vcmp.eq.s32.totalorder %v1164_v15, %v1188_v21  ;;  %vm213_vm3 = vcmp.eq.s32.totalorder %v1159_v13, %v1188_v21  ;;  %s927_s24 = scalar_lea.hbm (%p192_p1), %s926_s22, 4  ;;  %s931_s13 = scalar_lea.hbm (%p192_p1), %s1670_s2, 8 }
  0x3b   : >> { %724 = vmatpush.msk.msra.mxu0 %vm216_vm0, %v1000_v22  ;;  %v722_v24 = vsel %vm216_vm0, 1.0, %v1001_v23  ;;  %v721_v25 = vsel %vm215_vm1, 1.0, %v1001_v23  ;;  %vm212_vm4 = vcmp.eq.s32.totalorder %v1156_v12, %v1188_v21  ;;  %v720_v26 = vsel %vm214_vm2, 1.0, %v1001_v23  ;;  %740 = vmatpush.msk.msra.mxu3 %vm216_vm0, %v1000_v22  ;;  %p928_p4 = scmp.ne.s32.totalorder (%p192_p1), %s926_s22, %s927_s24  ;;  %p932_p10 = scmp.lt.s32.totalorder (%p192_p1), %s926_s22, %s1670_s2 }
  0x3c   : >> { %v1220_v27 = vsub.f32 %v722_v24, %v722_v24  ;;  %v1222_v28 = vsub.f32 %v721_v25, %v721_v25  ;;  %v1224_v29 = vsub.f32 %v720_v26, %v720_v26  ;;  %vm211_vm5 = vcmp.eq.s32.totalorder %v1153_v11, %v1188_v21  ;;  %p933_p2 = scmp.lt.s32.totalorder (%p192_p1), %s931_s13, %s927_s24 }
  0x3d   : >> { %725 = vmatpush.msk.msra.mxu0 %vm215_vm1, %v1000_v22  ;;  %v719_v30 = vsel %vm213_vm3, 1.0, %v1001_v23  ;;  %vm210_vm6 = vcmp.eq.s32.totalorder %v1150_v10, %v1188_v21  ;;  %v718_v31 = vsel %vm212_vm4, 1.0, %v1001_v23  ;;  %741 = vmatpush.msk.msra.mxu3 %vm215_vm1, %v1000_v22  ;;  %vm209_vm7 = vcmp.eq.s32.totalorder %v1147_v9, %v1188_v21  ;;  %p929_p8 = pnand (%p192_p1), %p928_p4, %p1084_p7 }
  0x3e   : >> { %v297_v32 = vand.u32 4294901760, %v1220_v27  ;;  %v303_v33 = vand.u32 4294901760, %v1222_v28  ;;  %v309_v34 = vand.u32 4294901760, %v1224_v29  ;;  %v1249_v35 = vsub.f32 %v719_v30, %v719_v30  ;;  %398 = vmatpush.msra.mxu2 %v1220_v27  ;;  %p934_p11 = por (%p192_p1), %p933_p2, %p932_p10 }
  0x3f   : >> { %726 = vmatpush.msk.msra.mxu0 %vm214_vm2, %v1000_v22  ;;  %v1256_v36 = vsub.f32 %v718_v31, %v718_v31  ;;  %v717_v37 = vsel %vm211_vm5, 1.0, %v1001_v23  ;;  %v716_v38 = vsel %vm210_vm6, 1.0, %v1001_v23  ;;  %742 = vmatpush.msk.msra.mxu3 %vm214_vm2, %v1000_v22  ;;  %vm208_vm8 = vcmp.eq.s32.totalorder %v1144_v8, %v1188_v21  ;;  %p930_p9 = pneg (%p192_p1), %p929_p8 }
  0x40   : >> { %v298_v39 = vsub.f32 %v1220_v27, %v297_v32  ;;  %v304_v40 = vsub.f32 %v1222_v28, %v303_v33  ;;  %v310_v41 = vsub.f32 %v1224_v29, %v309_v34  ;;  %v315_v42 = vand.u32 4294901760, %v1249_v35  ;;  %401 = vmatpush.msra.mxu2 %v1222_v28 }
  0x41   : >> { %727 = vmatpush.msk.msra.mxu0 %vm213_vm3, %v1000_v22  ;;  %v321_v43 = vand.u32 4294901760, %v1256_v36  ;;  %v1288_v44 = vsub.f32 %v717_v37, %v717_v37  ;;  %v1292_v45 = vsub.f32 %v716_v38, %v716_v38  ;;  %743 = vmatpush.msk.msra.mxu3 %vm213_vm3, %v1000_v22  ;;  %vm207_vm9 = vcmp.eq.s32.totalorder %v1141_v7, %v1188_v21  ;;  %p935_p12 = pnand (%p192_p1), %p934_p11, %p930_p9 }
  0x42   : >> { %v299_v46 = vand.u32 4294901760, %v298_v39  ;;  %v305_v47 = vand.u32 4294901760, %v304_v40  ;;  %v316_v48 = vsub.f32 %v1249_v35, %v315_v42  ;;  %404 = vmatpush.msra.mxu2 %v1224_v29  ;;  %v715_v51 = vsel %vm209_vm7, 1.0, %v1001_v23  ;;  %v253_v40 = vld [vmem:[%s252_s6] sm:$0x7] }
  0x43   : >> { %728 = vmatpush.msk.msra.mxu0 %vm212_vm4, %v1000_v22  ;;  %v327_v49 = vand.u32 4294901760, %v1288_v44  ;;  %v333_v50 = vand.u32 4294901760, %v1292_v45  ;;  %744 = vmatpush.msk.msra.mxu3 %vm212_vm4, %v1000_v22  ;;  %v311_v52 = vand.u32 4294901760, %v310_v41  ;;  %v322_v53 = vsub.f32 %v1256_v36, %v321_v43 }
  0x44   : >> { %300 = vmatpush.msra.mxu1 %v299_v46  ;;  %v1325_v54 = vsub.f32 %v715_v51, %v715_v51  ;;  %v714_v55 = vsel %vm208_vm8, 1.0, %v1001_v23  ;;  %407 = vmatpush.msra.mxu2 %v1249_v35  ;;  %vm206_vm10 = vcmp.eq.s32.totalorder %v1138_v6, %v1188_v21  ;;  %v317_v58 = vand.u32 4294901760, %v316_v48 }
  0x45   : >> { %729 = vmatpush.msk.msra.mxu0 %vm211_vm5, %v1000_v22  ;;  %v328_v56 = vsub.f32 %v1288_v44, %v327_v49  ;;  %v1341_v57 = vsub.f32 %v714_v55, %v714_v55  ;;  %745 = vmatpush.msk.msra.mxu3 %vm211_vm5, %v1000_v22  ;;  %vm205_vm11 = vcmp.eq.s32.totalorder %v1135_v5, %v1188_v21  ;;  %v713_v60 = vsel %vm207_vm9, 1.0, %v1001_v23 }
  0x46   : >> { %306 = vmatpush.msra.mxu1 %v305_v47  ;;  %v339_v59 = vand.u32 4294901760, %v1325_v54  ;;  %410 = vmatpush.msra.mxu2 %v1256_v36  ;;  %v334_v61 = vsub.f32 %v1292_v45, %v333_v50  ;;  %v1364_v63 = vsub.f32 %v713_v60, %v713_v60  ;;  %vm204_vm12 = vcmp.eq.s32.totalorder %v1132_v4, %v1188_v21 }
  0x47   : >> { %730 = vmatpush.msk.msra.mxu0 %vm210_vm6, %v1000_v22  ;;  %v345_v62 = vand.u32 4294901760, %v1341_v57  ;;  %746 = vmatpush.msk.msra.mxu3 %vm210_vm6, %v1000_v22  ;;  %v323_v0 = vand.u32 4294901760, %v322_v53  ;;  %v712_v19 = vsel %vm206_vm10, 1.0, %v1001_v23  ;;  %v711_v20 = vsel %vm205_vm11, 1.0, %v1001_v23 }
  0x48   : >> { %312 = vmatpush.msra.mxu1 %v311_v52  ;;  %413 = vmatpush.msra.mxu2 %v1288_v44  ;;  %v329_v24 = vand.u32 4294901760, %v328_v56  ;;  %v351_v25 = vand.u32 4294901760, %v1364_v63  ;;  %v1386_v26 = vsub.f32 %v712_v19, %v712_v19  ;;  %vm203_vm13 = vcmp.eq.s32.totalorder %v1129_v3, %v1188_v21 }
  0x49   : >> { %731 = vmatpush.msk.msra.mxu0 %vm209_vm7, %v1000_v22  ;;  %747 = vmatpush.msk.msra.mxu3 %vm209_vm7, %v1000_v22  ;;  %v340_v30 = vsub.f32 %v1325_v54, %v339_v59  ;;  %v1397_v31 = vsub.f32 %v711_v20, %v711_v20  ;;  %vm202_vm14 = vcmp.eq.s32.totalorder %v1126_v2, %v1188_v21  ;;  %v710_v37 = vsel %vm204_vm12, 1.0, %v1001_v23 }
  0x4a   : >> { %318 = vmatpush.msra.mxu1 %v317_v58  ;;  %416 = vmatpush.msra.mxu2 %v1292_v45  ;;  %v335_v38 = vand.u32 4294901760, %v334_v61  ;;  %v346_v39 = vsub.f32 %v1341_v57, %v345_v62  ;;  %v357_v41 = vand.u32 4294901760, %v1386_v26  ;;  %v1420_v46 = vsub.f32 %v710_v37, %v710_v37 }
  0x4b   : >> { %732 = vmatpush.msk.msra.mxu0 %vm208_vm8, %v1000_v22  ;;  %748 = vmatpush.msk.msra.mxu3 %vm208_vm8, %v1000_v22  ;;  %vm201_vm15 = vcmp.eq.s32.totalorder %v1123_v1, %v1188_v21  ;;  %v709_v47 = vsel %vm203_vm13, 1.0, %v1001_v23  ;;  %v352_v48 = vsub.f32 %v1364_v63, %v351_v25  ;;  %v708_v51 = vsel %vm202_vm14, 1.0, %v1001_v23 }
  0x4c   : >> { %324 = vmatpush.msra.mxu1 %v323_v0  ;;  %419 = vmatpush.msra.mxu2 %v1325_v54  ;;  %v341_v52 = vand.u32 4294901760, %v340_v30  ;;  %v363_v53 = vand.u32 4294901760, %v1397_v31  ;;  %v1445_v55 = vsub.f32 %v709_v47, %v709_v47  ;;  %v1448_v56 = vand.u32 4294901760, %v253_v40 }
  0x4d   : >> { %733 = vmatpush.msk.msra.mxu0 %vm207_vm9, %v1000_v22  ;;  %749 = vmatpush.msk.msra.mxu3 %vm207_vm9, %v1000_v22  ;;  %v347_v58 = vand.u32 4294901760, %v346_v39  ;;  %v707_v60 = vsel %vm201_vm15, 1.0, %v1001_v23  ;;  %v358_v61 = vsub.f32 %v1386_v26, %v357_v41  ;;  %v369_v0 = vand.u32 4294901760, %v1420_v46 }
  0x4e   : >> { %330 = vmatpush.msra.mxu1 %v329_v24  ;;  %422 = vmatpush.msra.mxu2 %v1341_v57  ;;  %v1466_v19 = vsub.f32 %v708_v51, %v708_v51  ;;  %v287_v20 = vsub.f32 %v253_v40, %v1448_v56  ;;  %v353_v23 = vand.u32 4294901760, %v352_v48  ;;  %v364_v24 = vsub.f32 %v1397_v31, %v363_v53 }
  0x4f   : >> { %734 = vmatpush.msk.msra.mxu0 %vm206_vm10, %v1000_v22  ;;  %750 = vmatpush.msk.msra.mxu3 %vm206_vm10, %v1000_v22  ;;  %v375_v30 = vand.u32 4294901760, %v1445_v55  ;;  %v1482_v37 = vsub.f32 %v707_v60, %v707_v60  ;;  %v359_v39 = vand.u32 4294901760, %v358_v61  ;;  %v370_v40 = vsub.f32 %v1420_v46, %v369_v0 }
  0x50   : >> { %336 = vmatpush.msra.mxu1 %v335_v38  ;;  %425 = vmatpush.msra.mxu2 %v1364_v63  ;;  %v288_v38 = vand.u32 4294901760, %v287_v20  ;;  %v381_v47 = vand.u32 4294901760, %v1466_v19  ;;  %v365_v51 = vand.u32 4294901760, %v364_v24 }
  0x51   : >> { %735 = vmatpush.msk.msra.mxu0 %vm205_vm11, %v1000_v22  ;;  %751 = vmatpush.msk.msra.mxu3 %vm205_vm11, %v1000_v22  ;;  %v371_v61 = vand.u32 4294901760, %v370_v40 }
  0x52   : >> { %342 = vmatpush.msra.mxu1 %v341_v52  ;;  %428 = vmatpush.msra.mxu2 %v1386_v26  ;;  %v289_v48 = vsub.f32 %v287_v20, %v288_v38  ;;  %v376_v52 = vsub.f32 %v1445_v55, %v375_v30 }
  0x53   : >> { %736 = vmatpush.msk.msra.mxu0 %vm204_vm12, %v1000_v22  ;;  %752 = vmatpush.msk.msra.mxu3 %vm204_vm12, %v1000_v22 }
  0x54   : >> { %348 = vmatpush.msra.mxu1 %v347_v58  ;;  %431 = vmatpush.msra.mxu2 %v1397_v31  ;;  %v387_v58 = vand.u32 4294901760, %v1482_v37  ;;  %v290_v60 = vand.u32 4294901760, %v289_v48  ;;  %v377_v24 = vand.u32 4294901760, %v376_v52 }
  0x55   : >> { %737 = vmatpush.msk.msra.mxu0 %vm203_vm13, %v1000_v22  ;;  %753 = vmatpush.msk.msra.mxu3 %vm203_vm13, %v1000_v22 }
  0x56   : >> { %354 = vmatpush.msra.mxu1 %v353_v23  ;;  %434 = vmatpush.msra.mxu2 %v1420_v46  ;;  %v382_v23 = vsub.f32 %v1466_v19, %v381_v47 }
  0x57   : >> { %738 = vmatpush.msk.msra.mxu0 %vm202_vm14, %v1000_v22  ;;  %754 = vmatpush.msk.msra.mxu3 %vm202_vm14, %v1000_v22 }
  0x58   : >> { %360 = vmatpush.msra.mxu1 %v359_v39  ;;  %437 = vmatpush.msra.mxu2 %v1445_v55  ;;  %v388_v39 = vsub.f32 %v1482_v37, %v387_v58  ;;  %v383_v40 = vand.u32 4294901760, %v382_v23 }
  0x59   : >> { %739 = vmatpush.msk.msra.mxu0 %vm201_vm15, %v1000_v22  ;;  %755 = vmatpush.msk.msra.mxu3 %vm201_vm15, %v1000_v22 }
  0x5a   : >> { %366 = vmatpush.msra.mxu1 %v365_v51  ;;  %440 = vmatpush.msra.mxu2 %v1466_v19  ;;  %v389_v48 = vand.u32 4294901760, %v388_v39 }
  0x5b   : >> { %492 = vmatpush.msrb.mxu0 %v297_v32  ;;  %485 = vmatmul.f32.vlgmr.msra.gmra.mxu3 %v288_v38 }
  0x5c   : >> { %291 = vmatmul.f32.vlgmr.msra.gmra.mxu0 %v290_v60  ;;  %372 = vmatpush.msra.mxu1 %v371_v61 }
  0x5d   : >> { %496 = vmatpush.msrb.mxu0 %v303_v33  ;;  %443 = vmatpush.msra.mxu2 %v1482_v37 }
  0x5e   : >> { %378 = vmatpush.msra.mxu1 %v377_v24  ;;  %446 = vmatmul.f32.vlgmr.msra.gmra.mxu2 %v287_v20 }
  0x5f   : >> { %500 = vmatpush.msrb.mxu0 %v309_v34 }
  0x60   : >> { %384 = vmatpush.msra.mxu1 %v383_v40 }
  0x61   : >> { %504 = vmatpush.msrb.mxu0 %v315_v42 }
  0x62   : >> { %390 = vmatpush.msra.mxu1 %v389_v48 }
  0x63   : >> { %508 = vmatpush.msrb.mxu0 %v321_v43  ;;  %392 = vmatmul.f32.vlgmr.msra.gmra.mxu1 %v1448_v56 }
  0x64   : >> { %756 = vmatpush.msk.msrb.mxu1 %vm216_vm0, %v1000_v22 }
  0x65   : >> { %512 = vmatpush.msrb.mxu0 %v327_v49 }
  0x66   : >> { %757 = vmatpush.msk.msrb.mxu1 %vm215_vm1, %v1000_v22 }
  0x67   : >> { %516 = vmatpush.msrb.mxu0 %v333_v50 }
  0x68   : >> { %758 = vmatpush.msk.msrb.mxu1 %vm214_vm2, %v1000_v22 }
  0x69   : >> { %520 = vmatpush.msrb.mxu0 %v339_v59 }
  0x6a   : >> { %759 = vmatpush.msk.msrb.mxu1 %vm213_vm3, %v1000_v22 }
  0x6b   : >> { %524 = vmatpush.msrb.mxu0 %v345_v62 }
  0x6c   : >> { %760 = vmatpush.msk.msrb.mxu1 %vm212_vm4, %v1000_v22 }
  0x6d   : >> { %528 = vmatpush.msrb.mxu0 %v351_v25 }
  0x6e   : >> { %761 = vmatpush.msk.msrb.mxu1 %vm211_vm5, %v1000_v22 }
  0x6f   : >> { %532 = vmatpush.msrb.mxu0 %v357_v41 }
  0x70   : >> { %762 = vmatpush.msk.msrb.mxu1 %vm210_vm6, %v1000_v22 }
  0x71   : >> { %536 = vmatpush.msrb.mxu0 %v363_v53 }
  0x72   : >> { %763 = vmatpush.msk.msrb.mxu1 %vm209_vm7, %v1000_v22 }
  0x73   : >> { %540 = vmatpush.msrb.mxu0 %v369_v0 }
  0x74   : >> { %764 = vmatpush.msk.msrb.mxu1 %vm208_vm8, %v1000_v22 }
  0x75   : >> { %544 = vmatpush.msrb.mxu0 %v375_v30 }
  0x76   : >> { %765 = vmatpush.msk.msrb.mxu1 %vm207_vm9, %v1000_v22 }
  0x77   : >> { %548 = vmatpush.msrb.mxu0 %v381_v47 }
  0x78   : >> { %766 = vmatpush.msk.msrb.mxu1 %vm206_vm10, %v1000_v22 }
  0x79   : >> { %552 = vmatpush.msrb.mxu0 %v387_v58 }
  0x7a   : >> { %767 = vmatpush.msk.msrb.mxu1 %vm205_vm11, %v1000_v22  ;;  %554 = vmatmul.f32.vlgmr.msrb.gmra.mxu0 %v1448_v56 }
  0x7c   : >> { %768 = vmatpush.msk.msrb.mxu1 %vm204_vm12, %v1000_v22 }
  0x7e   : >> { %769 = vmatpush.msk.msrb.mxu1 %vm203_vm13, %v1000_v22 }
  0x80   : >> { %770 = vmatpush.msk.msrb.mxu1 %vm202_vm14, %v1000_v22 }
  0x82   : >> { %771 = vmatpush.msk.msrb.mxu1 %vm201_vm15, %v1000_v22 }
  0x83   : >> { %591 = vmatmul.f32.vlgmr.msrb.gmra.mxu1 %v1448_v56 }
  0xd9   : >> { %v292_v28 = vpop.f32.mrf.mxu0 }
  0xde   : >> { %v486_v34 = vpop.f32.mrf.mxu3 }
  0xe0   : >> { %v393_v27 = vpop.f32.mrf.mxu1 }
  0xe1   : >> { %v394_v29 = vadd.f32 %v393_v27, %v292_v28  ;;  %v447_v32 = vpop.f32.mrf.mxu2 }
  0xe3   : >> { %v448_v33 = vadd.f32 %v447_v32, %v394_v29 }
  0xe5   : >> { %v487_v35 = vadd.f32 %v486_v34, %v448_v33 }
  0xf7   : >> { %v555_v36 = vpop.f32.mrf.mxu0 }
  0xf8   : >> { %v556_v42 = vadd.f32 %v555_v36, %v487_v35 }
 0x100   : >> { %v592_v43 = vpop.f32.mrf.mxu1 }
 0x101   : >> { %v593_v44 = vadd.f32 %v592_v43, %v556_v42  ;;  %194 = sbr.rel (!%p192_p1) target bundleno = 52 (0x34), region = 85 }
 0x103   : >> { %v595_v45 = vadd.f32 %v993_v18, %v593_v44  }
 0x105   : >> { %v1676_v18 = vmov %v595_v45  ;;  %596 = vst [vmem:[%s1172_s15] sm:$0x7] (%p192_p1), %v595_v45 }
 0x106   : > { %938 = shalt.err (!%p935_p12)
}
 0x107   : > { %782 = dma.vmem_to_hbm [thread:$0]  (%p1084_p7), %s611_s18, 64, %s613_s19, %s598_s21  }
 0x108 PF: > { %s624_s25 = sand.u32 1, %s977_s9   ;;  %p1677_p13 = scmp.ge.s32.totalorder %s989_s12, 2 }
 0x109   : > { %s625_s15 = scalar_lea.sflag [#allocation4], %s624_s25 }
 0x10a   : > { %p793_p0 = pnand %p1677_p13, %p1052_p6 }
 0x10c   : > { %p794_p3 = pneg %p793_p0 }
 0x10e   : > { %972 = dma.done.wait (%p794_p3), %s625_s15, 64  }
 0x10f   : > { %974 = vsyncadd (%p794_p3), %s625_s15, 4294967232  ;;  %p16_p5 = scmp.ge.s32.totalorder %s1070_s23, 4   ;;  %s1678_s9 = smov %s981_s10 }
 0x110   : > { %s1679_s10 = smov %s985_s11  ;;  %s1680_s11 = smov %s1080_s26 }
 0x111   : > { %s1681_s12 = smov %s1070_s23  ;;  %18 = sbr.rel (!%p16_p5) target bundleno = 6 (0x6), region = 96 }
 0x116   :  { %631 = vsyncpa [#allocation3], 1 }
 0x117   :  { %633 = vsyncpa [#allocation3 + $0x1], 1 }
 0x118   :  { %634 = vsyncpa [#allocation6], 1 }
 0x119   :  { %635 = vsyncpa [#allocation4], 1 }
 0x11a   :  { %637 = vsyncpa [#allocation4 + $0x1], 1 }

</bundles_post_ra>
